<compile_context>
chip_gen: v7x
topology: tpu7x:2x2x1
jax: 0.10.0
libtpu: 0.0.40
codegen_flags: <defaults>
</compile_context>

<pallas_src>
import functools

import jax
import jax.numpy as jnp
from jax.experimental import pallas as pl
from jax.experimental.pallas import tpu as pltpu


def _dice_sums_kernel(logit_ref, target_ref, sums_ref,
                      acc_int, acc_la, acc_ta, *,
                      hw, tile_hw, approx_recip):
    """Accumulate per-sample, per-class (intersect, logit_area, target_area).

    logit_ref : (C, TILE_HW) float   -- channels on sublanes, pixels on lanes
    target_ref: (1, TILE_HW) int32
    sums_ref  : (C, 3) f32           -- written once per sample (last HW tile)
    acc_*     : (C, TILE_HW) f32 VMEM scratch (per-lane partial sums)
    """
    j = pl.program_id(1)

    @pl.when(j == 0)
    def _():
        acc_int[...] = jnp.zeros_like(acc_int)
        acc_la[...] = jnp.zeros_like(acc_la)
        acc_ta[...] = jnp.zeros_like(acc_ta)

    x = logit_ref[...].astype(jnp.float32)              # (C, TILE_HW)
    t = target_ref[...]                                 # (1, TILE_HW) int32

    # Softmax over the channel (sublane) axis.
    m = jnp.max(x, axis=0, keepdims=True)               # (1, TILE_HW)
    e = jnp.exp(x - m)                                  # (C, TILE_HW)
    denom = jnp.sum(e, axis=0, keepdims=True)           # (1, TILE_HW)
    p = e * pl.reciprocal(denom, approx=approx_recip)   # (C, TILE_HW)

    # One-hot target via channel-index compare (no f32 one-hot temp).
    ch = jax.lax.broadcasted_iota(jnp.int32, x.shape, 0)  # (C, TILE_HW)
    onehot = ch == t                                      # bool (C, TILE_HW)

    if hw % tile_hw == 0:
        # No tail: mask is statically compiled out.
        p_valid = p
        oh = onehot
    else:
        lane = jax.lax.broadcasted_iota(jnp.int32, (1, tile_hw), 1)
        valid = (j * tile_hw + lane) < hw                 # (1, TILE_HW) bool
        p_valid = jnp.where(valid, p, 0.0)
        oh = jnp.logical_and(onehot, valid)

    # Lane-dense, VPU-only accumulation (cross-lane reduce deferred).
    acc_int[...] += jnp.where(oh, p, 0.0)
    acc_la[...] += p_valid
    acc_ta[...] += oh.astype(jnp.float32)

    @pl.when(j == pl.num_programs(1) - 1)
    def _():
        sums_ref[...] = jnp.concatenate(
            [jnp.sum(acc_int[...], axis=1, keepdims=True),
             jnp.sum(acc_la[...], axis=1, keepdims=True),
             jnp.sum(acc_ta[...], axis=1, keepdims=True)],
            axis=1)                                       # (C, 3)


def _pick_tile_hw(hw, c, target_block_bytes=2 * 1024 * 1024):
    """~2 MiB f32 logit block; lane extent multiple of 128 (or the full HW)."""
    max_tile = max(128, ((target_block_bytes // (4 * c)) // 128) * 128)
    return hw if hw <= max_tile else max_tile


def _dice_channel_sums(logit3, target3, *, tile_hw, approx_recip):
    N, C, HW = logit3.shape
    grid = (N, pl.cdiv(HW, tile_hw))
    kernel = functools.partial(_dice_sums_kernel, hw=HW, tile_hw=tile_hw,
                               approx_recip=approx_recip)
    return pl.pallas_call(
        kernel,
        out_shape=jax.ShapeDtypeStruct((N, C, 3), jnp.float32),
        grid_spec=pltpu.PrefetchScalarGridSpec(
            num_scalar_prefetch=0,
            grid=grid,
            in_specs=[
                # Native NCHW (reshaped): pixels on lanes, channels on sublanes.
                pl.BlockSpec((None, C, tile_hw), lambda n, j: (n, 0, j)),
                # Lane-dense int32 labels.
                pl.BlockSpec((None, 1, tile_hw), lambda n, j: (n, 0, j)),
            ],
            out_specs=pl.BlockSpec((None, C, 3), lambda n, j: (n, 0, 0)),
            scratch_shapes=[
                pltpu.VMEM((C, tile_hw), jnp.float32),   # intersect partials
                pltpu.VMEM((C, tile_hw), jnp.float32),   # logit-area partials
                pltpu.VMEM((C, tile_hw), jnp.float32),   # target-area partials
            ],
        ),
        compiler_params=pltpu.CompilerParams(
            # Batch axis parallel (v7x megacore); HW reduction axis arbitrary.
            dimension_semantics=("parallel", "arbitrary"),
            # Explicit, generation-safe: well under v7x's 64 MiB physical VMEM,
            # above v5e's 16 MiB default scoped limit.
            vmem_limit_bytes=48 * 1024 * 1024,
        ),
    )(logit3, target3)


@functools.partial(jax.jit,
                   static_argnames=("num_classes", "tile_hw", "approx_reciprocal"))
def multi_class_dice_loss(logit, target, weights=None, *, num_classes,
                          tile_hw=None, approx_reciprocal=True):
    """JAX/Pallas equivalent of MultiClassDiceLoss.forward.

    logit : (N, C, H, W) float logits (NCHW, like PyTorch; bf16 passes through)
    target: (N, H, W)    int labels in [0, num_classes)
    weights: optional (C,) per-class weights
    """
    N, C, H, W = logit.shape
    assert C == num_classes
    HW = H * W
    if tile_hw is None:
        tile_hw = _pick_tile_hw(HW, C)

    logit3 = logit.reshape(N, C, HW)                       # free reshape, no transpose
    target3 = target.reshape(N, 1, HW).astype(jnp.int32)

    sums = _dice_channel_sums(logit3, target3, tile_hw=tile_hw,
                              approx_recip=approx_reciprocal)   # (N, C, 3)
    intersect = sums[..., 0]                               # (N, C)
    logit_area = sums[..., 1]
    target_area = sums[..., 2]

    # Tiny O(N*C) epilogue kept in plain JAX (matches the PyTorch forward).
    smooth = 0.0001
    dice = (2.0 * intersect + smooth) / (logit_area + target_area + smooth)
    per_class_loss = 1.0 - jnp.sum(dice, axis=0) / N       # (C,)
    if weights is not None:
        per_class_loss = per_class_loss * weights
    return jnp.sum(per_class_loss)


def _reference_loss(logit, target, num_classes, weights=None):
    """Pure-JAX mirror of the PyTorch MultiClassDiceLoss.forward."""
    smooth = 0.0001
    p = jax.nn.softmax(logit.astype(jnp.float32), axis=1)            # (N,C,H,W)
    oh = jax.nn.one_hot(target, num_classes, dtype=jnp.float32)      # (N,H,W,C)
    oh = jnp.transpose(oh, (0, 3, 1, 2))                             # (N,C,H,W)
    N = logit.shape[0]
    loss = 0.0
    for i in range(num_classes):
        pi = p[:, i]
        ti = oh[:, i]
        inter = jnp.sum(pi * ti, axis=(-2, -1))
        dice = (2.0 * inter + smooth) / (jnp.sum(pi, axis=(-2, -1))
                                         + jnp.sum(ti, axis=(-2, -1)) + smooth)
        per_class = 1.0 - jnp.sum(dice) / N
        if weights is not None:
            per_class = per_class * weights[i]
        loss = loss + per_class
    return loss


if __name__ == "__main__":
    num_classes = 4
    N, H, W = 2, 16, 16

    key = jax.random.PRNGKey(0)
    k1, k2 = jax.random.split(key)
    logit = jax.random.normal(k1, (N, num_classes, H, W), dtype=jnp.float32)
    target = jax.random.randint(k2, (N, H, W), 0, num_classes, dtype=jnp.int32)

    ref = _reference_loss(logit, target, num_classes)

    # Exact-reciprocal path: tight check against the pure-JAX reference.
    loss_exact = multi_class_dice_loss(logit, target, num_classes=num_classes,
                                       approx_reciprocal=False)
    loss_exact = jax.block_until_ready(loss_exact)
    assert jnp.allclose(loss_exact, ref, atol=1e-5, rtol=1e-5), (loss_exact, ref)

    # Default fast path (EUP approximate reciprocal): looser tolerance that
    # still catches any structural error.
    loss_fast = multi_class_dice_loss(logit, target, num_classes=num_classes)
    loss_fast = jax.block_until_ready(loss_fast)
    assert jnp.allclose(loss_fast, ref, atol=2e-2, rtol=0.0), (loss_fast, ref)

    # Non-divisible spatial extent with a forced multi-tile grid: exercises the
    # cdiv grid, the in-kernel tail mask, and cross-tile accumulation.
    H2, W2 = 15, 20                                       # HW = 300
    k3, k4 = jax.random.split(k2)
    logit2 = jax.random.normal(k3, (N, num_classes, H2, W2), dtype=jnp.float32)
    target2 = jax.random.randint(k4, (N, H2, W2), 0, num_classes, dtype=jnp.int32)
    loss2 = multi_class_dice_loss(logit2, target2, num_classes=num_classes,
                                  tile_hw=128, approx_reciprocal=False)
    loss2 = jax.block_until_ready(loss2)
    ref2 = _reference_loss(logit2, target2, num_classes)
    assert jnp.allclose(loss2, ref2, atol=1e-5, rtol=1e-5), (loss2, ref2)

    print("KERNEL_OK")
</pallas_src>

<mosaic_0001>
module attributes {stable_mosaic.version = 11 : i64} {
  func.func @_dice_sums_kernel(%arg0: i32, %arg1: i32, %arg2: memref<1x4x256xf32, #tpu.memory_space<vmem>>, %arg3: memref<1x1x256xi32, #tpu.memory_space<vmem>>, %arg4: memref<1x4x3xf32, #tpu.memory_space<vmem>>, %arg5: memref<4x256xf32, #tpu.memory_space<vmem>>, %arg6: memref<4x256xf32, #tpu.memory_space<vmem>>, %arg7: memref<4x256xf32, #tpu.memory_space<vmem>>) attributes {dimension_semantics = [#tpu.dimension_semantics<parallel>, #tpu.dimension_semantics<arbitrary>], iteration_bounds = array<i64: 2, 1>, scalar_prefetch = 0 : i64, scratch_operands = 3 : i64, tpu.core_type = #tpu.core_type<tc>, window_params = [{transform_indices = @transform_0, window_bounds = array<i64: 1, 4, 256>}, {transform_indices = @transform_1, window_bounds = array<i64: 1, 1, 256>}, {transform_indices = @transform_2, window_bounds = array<i64: 1, 4, 3>}]} {
    %c0_i32 = arith.constant 0 : i32
    %0 = arith.cmpi eq, %arg1, %c0_i32 : i32
    %1 = arith.extui %0 : i1 to i32
    %c0_i32_0 = arith.constant 0 : i32
    %2 = arith.cmpi ne, %1, %c0_i32_0 : i32
    scf.if %2 {
      %cst_22 = arith.constant 0.000000e+00 : f32
      %36 = vector.broadcast %cst_22 : f32 to vector<4x256xf32>
      %c0_23 = arith.constant 0 : index
      %c0_24 = arith.constant 0 : index
      %37 = vector.load %arg5[%c0_23, %c0_24] : memref<4x256xf32, #tpu.memory_space<vmem>>, vector<4x256xf32>
      tpu.vector_store %arg5[%c0_23, %c0_24], %36 {strides = array<i32>} : memref<4x256xf32, #tpu.memory_space<vmem>>, vector<4x256xf32>,
      %cst_25 = arith.constant 0.000000e+00 : f32
      %38 = vector.broadcast %cst_25 : f32 to vector<4x256xf32>
      %c0_26 = arith.constant 0 : index
      %c0_27 = arith.constant 0 : index
      %39 = vector.load %arg6[%c0_26, %c0_27] : memref<4x256xf32, #tpu.memory_space<vmem>>, vector<4x256xf32>
      tpu.vector_store %arg6[%c0_26, %c0_27], %38 {strides = array<i32>} : memref<4x256xf32, #tpu.memory_space<vmem>>, vector<4x256xf32>,
      %cst_28 = arith.constant 0.000000e+00 : f32
      %40 = vector.broadcast %cst_28 : f32 to vector<4x256xf32>
      %c0_29 = arith.constant 0 : index
      %c0_30 = arith.constant 0 : index
      %41 = vector.load %arg7[%c0_29, %c0_30] : memref<4x256xf32, #tpu.memory_space<vmem>>, vector<4x256xf32>
      tpu.vector_store %arg7[%c0_29, %c0_30], %40 {strides = array<i32>} : memref<4x256xf32, #tpu.memory_space<vmem>>, vector<4x256xf32>,
    } else {
    }
    %c0 = arith.constant 0 : index
    %c0_1 = arith.constant 0 : index
    %c0_2 = arith.constant 0 : index
    %3 = vector.load %arg2[%c0, %c0_1, %c0_2] : memref<1x4x256xf32, #tpu.memory_space<vmem>>, vector<1x4x256xf32>
    %4 = vector.shape_cast %3 : vector<1x4x256xf32> to vector<4x256xf32>
    %c0_3 = arith.constant 0 : index
    %c0_4 = arith.constant 0 : index
    %c0_5 = arith.constant 0 : index
    %5 = vector.load %arg3[%c0_3, %c0_4, %c0_5] : memref<1x1x256xi32, #tpu.memory_space<vmem>>, vector<1x1x256xi32>
    %6 = vector.shape_cast %5 : vector<1x1x256xi32> to vector<1x256xi32>
    %cst = arith.constant dense<0xFF800000> : vector<256xf32>
    %7 = vector.multi_reduction <maximumf>, %4, %cst [0] : vector<4x256xf32> to vector<256xf32>
    %8 = vector.shape_cast %7 : vector<256xf32> to vector<1x256xf32>
    %9 = vector.broadcast %8 : vector<1x256xf32> to vector<4x256xf32>
    %10 = arith.subf %4, %9 : vector<4x256xf32>
    %11 = math.exp %10 : vector<4x256xf32>
    %cst_6 = arith.constant dense<0.000000e+00> : vector<256xf32>
    %12 = vector.multi_reduction <add>, %11, %cst_6 [0] : vector<4x256xf32> to vector<256xf32>
    %13 = vector.shape_cast %12 : vector<256xf32> to vector<1x256xf32>
    %14 = tpu.reciprocal %13 : vector<1x256xf32> -> vector<1x256xf32>
    %15 = vector.broadcast %14 : vector<1x256xf32> to vector<4x256xf32>
    %16 = arith.mulf %11, %15 : vector<4x256xf32>
    %17 = tpu.iota {dimensions = array<i32: 0>} : vector<4x256xi32>
    %18 = vector.broadcast %6 : vector<1x256xi32> to vector<4x256xi32>
    %19 = arith.cmpi eq, %17, %18 : vector<4x256xi32>
    %c0_7 = arith.constant 0 : index
    %c0_8 = arith.constant 0 : index
    %20 = vector.load %arg5[%c0_7, %c0_8] : memref<4x256xf32, #tpu.memory_space<vmem>>, vector<4x256xf32>
    %cst_9 = arith.constant 0.000000e+00 : f32
    %21 = vector.broadcast %cst_9 : f32 to vector<4x256xf32>
    %22 = arith.select %19, %16, %21 : vector<4x256xi1>, vector<4x256xf32>
    %23 = arith.addf %20, %22 : vector<4x256xf32>
    %c0_10 = arith.constant 0 : index
    %c0_11 = arith.constant 0 : index
    %24 = vector.load %arg5[%c0_10, %c0_11] : memref<4x256xf32, #tpu.memory_space<vmem>>, vector<4x256xf32>
    tpu.vector_store %arg5[%c0_10, %c0_11], %23 {strides = array<i32>} : memref<4x256xf32, #tpu.memory_space<vmem>>, vector<4x256xf32>,
    %c0_12 = arith.constant 0 : index
    %c0_13 = arith.constant 0 : index
    %25 = vector.load %arg6[%c0_12, %c0_13] : memref<4x256xf32, #tpu.memory_space<vmem>>, vector<4x256xf32>
    %26 = arith.addf %25, %16 : vector<4x256xf32>
    %c0_14 = arith.constant 0 : index
    %c0_15 = arith.constant 0 : index
    %27 = vector.load %arg6[%c0_14, %c0_15] : memref<4x256xf32, #tpu.memory_space<vmem>>, vector<4x256xf32>
    tpu.vector_store %arg6[%c0_14, %c0_15], %26 {strides = array<i32>} : memref<4x256xf32, #tpu.memory_space<vmem>>, vector<4x256xf32>,
    %c0_16 = arith.constant 0 : index
    %c0_17 = arith.constant 0 : index
    %28 = vector.load %arg7[%c0_16, %c0_17] : memref<4x256xf32, #tpu.memory_space<vmem>>, vector<4x256xf32>
    %29 = arith.extui %19 : vector<4x256xi1> to vector<4x256xi32>
    %30 = arith.sitofp %29 : vector<4x256xi32> to vector<4x256xf32>
    %31 = arith.addf %28, %30 : vector<4x256xf32>
    %c0_18 = arith.constant 0 : index
    %c0_19 = arith.constant 0 : index
    %32 = vector.load %arg7[%c0_18, %c0_19] : memref<4x256xf32, #tpu.memory_space<vmem>>, vector<4x256xf32>
    tpu.vector_store %arg7[%c0_18, %c0_19], %31 {strides = array<i32>} : memref<4x256xf32, #tpu.memory_space<vmem>>, vector<4x256xf32>,
    %c0_i32_20 = arith.constant 0 : i32
    %33 = arith.cmpi eq, %arg1, %c0_i32_20 : i32
    %34 = arith.extui %33 : i1 to i32
    %c0_i32_21 = arith.constant 0 : i32
    %35 = arith.cmpi ne, %34, %c0_i32_21 : i32
    scf.if %35 {
      %c0_22 = arith.constant 0 : index
      %c0_23 = arith.constant 0 : index
      %36 = vector.load %arg5[%c0_22, %c0_23] : memref<4x256xf32, #tpu.memory_space<vmem>>, vector<4x256xf32>
      %cst_24 = arith.constant dense<0.000000e+00> : vector<4xf32>
      %37 = vector.multi_reduction <add>, %36, %cst_24 [1] : vector<4x256xf32> to vector<4xf32>
      %38 = vector.shape_cast %37 : vector<4xf32> to vector<4x1xf32>
      %c0_25 = arith.constant 0 : index
      %c0_26 = arith.constant 0 : index
      %39 = vector.load %arg6[%c0_25, %c0_26] : memref<4x256xf32, #tpu.memory_space<vmem>>, vector<4x256xf32>
      %cst_27 = arith.constant dense<0.000000e+00> : vector<4xf32>
      %40 = vector.multi_reduction <add>, %39, %cst_27 [1] : vector<4x256xf32> to vector<4xf32>
      %41 = vector.shape_cast %40 : vector<4xf32> to vector<4x1xf32>
      %c0_28 = arith.constant 0 : index
      %c0_29 = arith.constant 0 : index
      %42 = vector.load %arg7[%c0_28, %c0_29] : memref<4x256xf32, #tpu.memory_space<vmem>>, vector<4x256xf32>
      %cst_30 = arith.constant dense<0.000000e+00> : vector<4xf32>
      %43 = vector.multi_reduction <add>, %42, %cst_30 [1] : vector<4x256xf32> to vector<4xf32>
      %44 = vector.shape_cast %43 : vector<4xf32> to vector<4x1xf32>
      %45 = tpu.concatenate %38, %41, %44 in 1 : vector<4x1xf32>, vector<4x1xf32>, vector<4x1xf32> -> vector<4x3xf32>
      %c0_31 = arith.constant 0 : index
      %c0_32 = arith.constant 0 : index
      %c0_33 = arith.constant 0 : index
      %46 = vector.load %arg4[%c0_31, %c0_32, %c0_33] : memref<1x4x3xf32, #tpu.memory_space<vmem>>, vector<1x4x3xf32>
      %47 = vector.shape_cast %46 : vector<1x4x3xf32> to vector<4x3xf32>
      %48 = vector.shape_cast %45 : vector<4x3xf32> to vector<1x4x3xf32>
      tpu.vector_store %arg4[%c0_31, %c0_32, %c0_33], %48 {strides = array<i32>} : memref<1x4x3xf32, #tpu.memory_space<vmem>>, vector<1x4x3xf32>,
    } else {
    }
    return
  }
  func.func @transform_0(%arg0: i32, %arg1: i32) -> (i32, i32, i32) {
    %c0_i32 = arith.constant 0 : i32
    %c0_i32_0 = arith.constant 0 : i32
    return %arg0, %c0_i32, %arg1 : i32, i32, i32
  }
  func.func @transform_1(%arg0: i32, %arg1: i32) -> (i32, i32, i32) {
    %c0_i32 = arith.constant 0 : i32
    %c0_i32_0 = arith.constant 0 : i32
    return %arg0, %c0_i32, %arg1 : i32, i32, i32
  }
  func.func @transform_2(%arg0: i32, %arg1: i32) -> (i32, i32, i32) {
    %c0_i32 = arith.constant 0 : i32
    %c0_i32_0 = arith.constant 0 : i32
    %c0_i32_1 = arith.constant 0 : i32
    return %arg0, %c0_i32, %c0_i32_0 : i32, i32, i32
  }
}

</mosaic_0001>

<bundles_post_ra>
// kernel: multi_class_dice_loss.1
= control target key start
LH: loop header
LB: loop body
LE: loop exit
PB: predicated region body
PF: predicated region fallthrough
CT: control target
= control target key end

     0   :  { %s505_s9 = smov 0   ;;  %s507_s10 = smov 0   ;;  %s570_s0 = inlined_call_operand.vmem [shape: f32[2,4,256], index: 0, kind: input, shape index: {}]   ;;  %s571_s1 = inlined_call_operand.vmem [shape: s32[2,1,256], index: 1, kind: input, shape index: {}]   ;;  %s572_s2 = inlined_call_operand.vmem [shape: f32[2,4,3], index: 2, kind: output, shape index: {}]  }
   0x1   :  { %s509_s11 = smov 0  }
   0x2 LB: > { %s24_s12 = sadd.s32 1, %s483_s10  ;;  %p421_p0 = scmp.ge.s32.totalorder %s487_s11, 1  ;;  %s487_s11 = sphi %s509_s11, %s12_s11   ;;  %s483_s10 = sphi %s507_s10, %s574_s10   ;;  %s479_s9 = sphi %s505_s9, %s573_s9  }
   0x3   : > { %p26_p1 = scmp.ge.s32.totalorder %s24_s12, 2  ;;  %p147_p2 = scmp.lt.s32.totalorder %s487_s11, 3 }
   0x5   : > { %s576_s12 = smov (%p26_p1, %s24_s12), 0  ;;  %p148_p3 = pnand %p421_p0, %p147_p2 }
   0x6   : > { %p181_p4 = scmp.lt.s32.totalorder (!%p148_p3), %s479_s9, 1  ;;  %v261_v0 = vlaneseq (!%p148_p3)  ;;  %vm215_vm0 = vcmask (!%p148_p3), 1043456   ;;  %v489_v14 = vmov (!%p148_p3), 0.0   ;;  %vm329_vm3 = vcmask (!%p148_p3), 7168  }
   0x7   : > { %151 = sbr.rel (%p148_p3) target bundleno = 237 (0xed), region = 28  ;;  %vm331_vm4 = vcmask (!%p148_p3), 15360   ;;  %vm333_vm5 = vcmask (!%p148_p3), 19456  }
   0x8   : > { %v525_v1 = vshrl.u32 (!%p148_p3), %v261_v0, 7 }
   0xa   : > { %v265_v2 = vsub.s32 (!%p148_p3), 0, %v525_v1  ;;  %v269_v3 = vsub.s32 (!%p148_p3), 1, %v525_v1 }
   0xe   : > { %s578_s9 = smov (!%p181_p4, %s479_s9), 1 }
   0xf   : > { %s430_s13 = sshll.u32 %s578_s9, 3  ;;  %s424_s14 = sshll.u32 %s578_s9, 1 }
  0x10   : > { %s188_s17 = scalar_lea.vmem %s570_s0, %s430_s13  ;;  %s197_s20 = scalar_lea.vmem %s571_s1, %s424_s14 }
  0x11   : > { %v210_v4 = vld [vmem:[%s188_s17] sm:$0xff]  ;;  %s425_s21 = sshll.u32 %s578_s9, 2 }
  0x12   : > { %v211_v5 = vld [vmem:[%s197_s20] sm:$0x3]  ;;  %v213_v6 = vcombine.high %v210_v4, %v210_v4  ;;  %v216_v7 = vsel %vm215_vm0, %v210_v4, -inf  ;;  %s202_s24 = scalar_lea.vmem %s572_s2, %s425_s21 }
  0x13   : > { %v266_v8 = vrot.slane %v211_v5, %v265_v2  ;;  %v270_v9 = vrot.slane %v211_v5, %v269_v3  ;;  %v217_v10 = vrot.slane %v216_v7, 4 }
  0x14   : > { %v223_v11 = vsel %vm215_vm0, %v213_v6, -inf }
  0x15   : > { %vm271_vm1 = vcmp.eq.s32.totalorder %v525_v1, %v266_v8  ;;  %vm272_vm2 = vcmp.eq.s32.totalorder %v525_v1, %v270_v9  ;;  %v218_v12 = vmax.f32 %v216_v7, %v217_v10  ;;  %v224_v13 = vrot.slane %v223_v11, 4 }
  0x16   : > { %v426_v15 = vsel %vm271_vm1, 1.0, %v489_v14  ;;  %v427_v16 = vsel %vm272_vm2, 1.0, %v489_v14 }
  0x17   : > { %v295_v17 = vcombine.low %v426_v15, %v427_v16  ;;  %v432_v18 = vcombine.low %v427_v16, %v427_v16  ;;  %v219_v19 = vrot.slane %v218_v12, 2  ;;  %v225_v20 = vmax.f32 %v223_v11, %v224_v13 }
  0x19   : > { %v324_v21 = vsel %vm215_vm0, %v295_v17, 0.0  ;;  %v325_v22 = vsel %vm215_vm0, %v432_v18, 0.0  ;;  %v220_v23 = vmax.f32 %v218_v12, %v219_v19  ;;  %v226_v24 = vrot.slane %v225_v20, 2 }
  0x1a   : > { %v326_v25 = vadd.f32 %v325_v22, %v324_v21 }
  0x1b   : > { %v221_v26 = vrot.slane %v220_v23, 1  ;;  %v227_v27 = vmax.f32 %v225_v20, %v226_v24 }
  0x1c   : > { %327 = vadd.xlane.f32.xlu1 %v326_v25 }
  0x1d   : > { %v222_v28 = vmax.f32 %v220_v23, %v221_v26  ;;  %v228_v29 = vrot.slane %v227_v27, 1 }
  0x1f   : > { %v229_v30 = vmax.f32 %v227_v27, %v228_v29 }
  0x21   : > { %v232_v31 = vcombine.low %v222_v28, %v229_v30 }
  0x23   : > { %v234_v32 = vsub.f32 %v210_v4, %v232_v31 }
  0x25   : > { %v235_v33 = vmul.f32 1.442695, %v234_v32 }
  0x27   : > { %459 = vpow2.f32 %v235_v33 }
  0x31   : > { %v460_v34 = vpop.eup %459 }
  0x32   : > { %v238_v35 = vcombine.high %v460_v34, %v460_v34  ;;  %v240_v36 = vsel %vm215_vm0, %v460_v34, 0.0 }
  0x33   : > { %v241_v37 = vrot.slane %v240_v36, 4 }
  0x34   : > { %v247_v38 = vsel %vm215_vm0, %v238_v35, 0.0 }
  0x35   : > { %v242_v39 = vadd.f32 %v241_v37, %v240_v36  ;;  %v248_v40 = vrot.slane %v247_v38, 4 }
  0x37   : > { %v243_v41 = vrot.slane %v242_v39, 2  ;;  %v249_v42 = vadd.f32 %v248_v40, %v247_v38 }
  0x39   : > { %v244_v43 = vadd.f32 %v243_v41, %v242_v39  ;;  %v250_v44 = vrot.slane %v249_v42, 2 }
  0x3b   : > { %v245_v45 = vrot.slane %v244_v43, 1  ;;  %v251_v46 = vadd.f32 %v250_v44, %v249_v42 }
  0x3d   : > { %v246_v47 = vadd.f32 %v245_v45, %v244_v43  ;;  %v252_v48 = vrot.slane %v251_v46, 1 }
  0x3f   : > { %v253_v49 = vadd.f32 %v252_v48, %v251_v46  ;;  %461 = vrcp.f32 %v246_v47 }
  0x41   : > { %463 = vrcp.f32 %v253_v49 }
  0x49   : > { %v462_v50 = vpop.eup %461 }
  0x4b   : > { %v464_v51 = vpop.eup %463 }
  0x4c   : > { %v258_v52 = vcombine.low %v462_v50, %v464_v51 }
  0x4e   : > { %v260_v53 = vmul.f32 %v460_v34, %v258_v52 }
  0x50   : > { %v275_v54 = vcombine.high %v260_v53, %v260_v53  ;;  %v277_v55 = vsel %vm271_vm1, %v260_v53, 0.0  ;;  %v315_v61 = vsel %vm215_vm0, %v260_v53, 0.0 }
  0x52   : > { %v278_v56 = vsel %vm272_vm2, %v275_v54, 0.0  ;;  %v316_v62 = vsel %vm215_vm0, %v275_v54, 0.0 }
  0x53   : > { %v281_v57 = vcombine.low %v277_v55, %v278_v56  ;;  %v431_v58 = vcombine.low %v278_v56, %v278_v56  ;;  %v317_v0 = vadd.f32 %v316_v62, %v315_v61 }
  0x55   : > { %v306_v59 = vsel %vm215_vm0, %v281_v57, 0.0  ;;  %v307_v60 = vsel %vm215_vm0, %v431_v58, 0.0 }
  0x56   : > { %v308_v63 = vadd.f32 %v307_v60, %v306_v59 }
  0x58   : > { %309 = vadd.xlane.f32.xlu0 %v308_v63 }
  0x5c   : > { %318 = vadd.xlane.f32.xlu0 %v317_v0 }
  0xa9   : > { %v328_v1 = vpop.xlane.xlu1 %327 }
  0xe5   : > { %v310_v2 = vpop.xlane.xlu0 %309 }
  0xe9   : > { %v319_v3 = vpop.xlane.xlu0 %318 }
  0xea   : > { %v330_v4 = vsel %vm329_vm3, %v310_v2, %v319_v3 }
  0xeb   : > { %v332_v5 = vsel %vm331_vm4, %v330_v4, %v328_v1 }
  0xec   : > { %334 = vst.msk [vmem:[%s202_s24] sm:$0xf] %vm333_vm5, %v332_v5 }
  0xed PF: > { %s12_s11 = sadd.s32 1, %s487_s11   ;;  %s573_s9 = smov %s483_s10 }
  0xee   : > { %p9_p5 = scmp.ge.s32.totalorder %s12_s11, 4   ;;  %s574_s10 = smov %s576_s12 }
  0xf0   :  { %11 = sbr.rel (!%p9_p5) target bundleno = 2 (0x2), region = 69 }

</bundles_post_ra>
